<compile_context>
chip_gen: v7x
topology: tpu7x:2x2x1
jax: 0.10.0
libtpu: 0.0.40
codegen_flags: <defaults>
</compile_context>

<pallas_src>
import functools

import jax
import jax.numpy as jnp
from jax.experimental import pallas as pl
from jax.experimental.pallas import tpu as pltpu


def _dice_kernel(x_ref, t_ref, o_ref, inter_ref, card_ref, *,
                 eps, tile_nc, tile_hw, nc_rem, hw_rem, nc_tiles, hw_tiles):
    # x_ref, t_ref : (tile_nc, tile_hw) blocks in the original input dtype.
    # o_ref        : (8, 128) f32 block holding this HW tile's partial sum
    #                (broadcast across the block).
    # inter_ref, card_ref : (8, tile_hw) f32 accumulators, persistent across
    #                the reduction (k) grid axis.
    h = pl.program_id(0)
    k = pl.program_id(1)

    @pl.when(k == 0)
    def _():
        inter_ref[...] = jnp.zeros_like(inter_ref)
        card_ref[...] = jnp.zeros_like(card_ref)

    def _accumulate(mask_rows):
        x = x_ref[...]
        t = t_ref[...]
        if mask_rows:
            # Edge block past the end of N*C: out-of-bounds rows contain
            # garbage (possibly NaN/Inf), so zero them before they touch the
            # accumulators.
            rows = jax.lax.broadcasted_iota(jnp.int32, (tile_nc, tile_hw), 0)
            keep = rows < nc_rem
            x = jnp.where(keep, x, jnp.zeros_like(x))
            t = jnp.where(keep, t, jnp.zeros_like(t))
        xf = x.astype(jnp.float32)
        tf = t.astype(jnp.float32)
        prod = xf * tf
        plus = xf + tf
        if tile_nc > 8:
            # Partial-reduce this block's N*C rows down to 8 sublanes with
            # cheap leading-dim VPU adds; the single cross-sublane reduce is
            # deferred to the finalize step (once per HW tile).
            prod = jnp.sum(prod.reshape(tile_nc // 8, 8, tile_hw), axis=0)
            plus = jnp.sum(plus.reshape(tile_nc // 8, 8, tile_hw), axis=0)
        inter_ref[...] += prod
        card_ref[...] += plus

    if nc_rem == 0:
        _accumulate(False)                 # fully aligned: never mask
    elif nc_tiles == 1:
        _accumulate(True)                  # single (ragged) reduction step
    else:
        # Keep the hot path mask-free; only the last reduction step masks.
        @pl.when(k < nc_tiles - 1)
        def _():
            _accumulate(False)

        @pl.when(k == nc_tiles - 1)
        def _():
            _accumulate(True)

    @pl.when(k == nc_tiles - 1)
    def _():
        inter = jnp.sum(inter_ref[...], axis=0, keepdims=True)   # (1, tile_hw)
        card = jnp.sum(card_ref[...], axis=0, keepdims=True)
        loss = 1.0 - 2.0 * inter / (card + eps)
        if hw_rem != 0:
            # Zero the contribution of out-of-bounds H*W columns (only the
            # last HW tile has any; the select also squashes any NaN/Inf
            # garbage accumulated in those columns).
            cols = jax.lax.broadcasted_iota(jnp.int32, (1, tile_hw), 1)
            limit = jnp.where(h == hw_tiles - 1,
                              jnp.int32(hw_rem), jnp.int32(tile_hw))
            loss = jnp.where(cols < limit, loss, 0.0)
        part = jnp.sum(loss, axis=1, keepdims=True)               # (1, 1)
        o_ref[...] = jnp.broadcast_to(part, o_ref.shape)


def _round_up(a, b):
    return (a + b - 1) // b * b


def _choose_tiles(nc, hw, itemsize, *, max_tile_nc=128,
                  vmem_budget_bytes=12 * 1024 * 1024):
    # Reduction (sublane) tile: always a multiple of 8 (required by the
    # in-kernel 8-sublane partial reduce), capped.
    tile_nc = min(_round_up(nc, 8), max_tile_nc)

    # Lane tile: multiple of 128.  Size it from a *byte* budget:
    #   total VMEM ~= 2 inputs x 2 pipeline buffers x (tile_nc*tile_hw*itemsize)
    #              +  2 x (8*tile_hw*4) f32 accumulators
    # so 16-bit inputs get ~2x the elements of f32 blocks while everything
    # stays under the default scoped-VMEM limit on v5e/v6e/v7x.
    hw_ceil = _round_up(hw, 128)
    per_col_bytes = 4 * tile_nc * itemsize + 64
    tile_hw = max(128, (vmem_budget_bytes // per_col_bytes) // 128 * 128)
    tile_hw = min(tile_hw, hw_ceil)
    # Give the parallel (HW) grid axis at least 2 steps whenever the image
    # allows it, so v7x can shard the axis across both TensorCores.
    if hw_ceil >= 256 and pl.cdiv(hw_ceil, tile_hw) < 2:
        tile_hw = _round_up(pl.cdiv(hw_ceil, 2), 128)
    return tile_nc, tile_hw


def dice_loss(inputs, target, *, eps=1e-6):
    """inputs, target: (N, C, H, W); target already one-hot (as in the
    reference forward).  Returns a scalar loss."""
    assert inputs.ndim == 4 and inputs.shape == target.shape
    N, C, H, W = inputs.shape
    NC, HW = N * C, H * W

    # Free reshapes (row-major contiguous); no padding, no dtype change.
    x = inputs.reshape(NC, HW)
    t = target.reshape(NC, HW)

    itemsize = max(jnp.dtype(inputs.dtype).itemsize,
                   jnp.dtype(target.dtype).itemsize)
    tile_nc, tile_hw = _choose_tiles(NC, HW, itemsize)
    assert tile_nc % 8 == 0 and tile_hw % 128 == 0

    nc_tiles = pl.cdiv(NC, tile_nc)
    hw_tiles = pl.cdiv(HW, tile_hw)

    kernel = functools.partial(
        _dice_kernel, eps=float(eps), tile_nc=tile_nc, tile_hw=tile_hw,
        nc_rem=NC % tile_nc, hw_rem=HW % tile_hw,
        nc_tiles=nc_tiles, hw_tiles=hw_tiles)

    out = pl.pallas_call(
        kernel,
        out_shape=jax.ShapeDtypeStruct((8, 128 * hw_tiles), jnp.float32),
        grid_spec=pltpu.PrefetchScalarGridSpec(
            num_scalar_prefetch=0,
            grid=(hw_tiles, nc_tiles),
            in_specs=[
                pl.BlockSpec((tile_nc, tile_hw), lambda h, k: (k, h)),
                pl.BlockSpec((tile_nc, tile_hw), lambda h, k: (k, h)),
            ],
            out_specs=pl.BlockSpec((8, 128), lambda h, k: (0, h)),
            scratch_shapes=[
                pltpu.VMEM((8, tile_hw), jnp.float32),
                pltpu.VMEM((8, tile_hw), jnp.float32),
            ],
        ),
        compiler_params=pltpu.CompilerParams(
            dimension_semantics=("parallel", "arbitrary")),
    )(x, t)

    # One partial sum of (1 - dice) per HW tile; finish the (tiny) mean here.
    partial_sums = out[0, ::128]                      # (hw_tiles,)
    return jnp.sum(partial_sums) / HW


def _dice_loss_ref(inputs, target, *, eps=1e-6):
    x = inputs.astype(jnp.float32)
    t = target.astype(jnp.float32)
    intersection = jnp.sum(x * t, axis=(0, 1))
    cardinality = jnp.sum(x + t, axis=(0, 1))
    dice_score = 2.0 * intersection / (cardinality + eps)
    return jnp.mean(1.0 - dice_score)


if __name__ == "__main__":
    key = jax.random.PRNGKey(0)

    def make_case(case_key, shape, dtype):
        n, c, hh, ww = shape
        k_x, k_t = jax.random.split(case_key)
        logits = jax.random.normal(k_x, shape, dtype=jnp.float32)
        probs = jax.nn.softmax(logits, axis=1).astype(dtype)
        labels = jax.random.randint(k_t, (n, hh, ww), 0, c)
        onehot = jax.nn.one_hot(labels, c, axis=1, dtype=dtype)
        return probs, onehot

    cases = [
        ((2, 4, 16, 16), jnp.float32, 1e-5),    # aligned N*C and H*W
        ((2, 3, 7, 9), jnp.float32, 1e-5),      # ragged N*C (=6) and H*W (=63)
        ((2, 4, 16, 16), jnp.bfloat16, 1e-4),   # 16-bit input path
    ]
    keys = jax.random.split(key, len(cases))
    for case_key, (shape, dtype, tol) in zip(keys, cases):
        probs, onehot = make_case(case_key, shape, dtype)
        out = jax.block_until_ready(dice_loss(probs, onehot))
        ref = _dice_loss_ref(probs, onehot)
        assert out.shape == ()
        assert jnp.allclose(out, ref, atol=tol, rtol=tol), (shape, dtype, out, ref)

    print("KERNEL_OK")
</pallas_src>

<mosaic_0001>
module attributes {stable_mosaic.version = 11 : i64} {
  func.func @_dice_kernel(%arg0: i32, %arg1: i32, %arg2: memref<8x128xf32, #tpu.memory_space<vmem>>, %arg3: memref<8x128xf32, #tpu.memory_space<vmem>>, %arg4: memref<8x128xf32, #tpu.memory_space<vmem>>, %arg5: memref<8x128xf32, #tpu.memory_space<vmem>>, %arg6: memref<8x128xf32, #tpu.memory_space<vmem>>) attributes {dimension_semantics = [#tpu.dimension_semantics<parallel>, #tpu.dimension_semantics<arbitrary>], iteration_bounds = array<i64: 2, 1>, scalar_prefetch = 0 : i64, scratch_operands = 2 : i64, tpu.core_type = #tpu.core_type<tc>, window_params = [{transform_indices = @transform_0, window_bounds = array<i64: 8, 128>}, {transform_indices = @transform_1, window_bounds = array<i64: 8, 128>}, {transform_indices = @transform_2, window_bounds = array<i64: 8, 128>}]} {
    %c0_i32 = arith.constant 0 : i32
    %0 = arith.cmpi eq, %arg1, %c0_i32 : i32
    %1 = arith.extui %0 : i1 to i32
    %c0_i32_0 = arith.constant 0 : i32
    %2 = arith.cmpi ne, %1, %c0_i32_0 : i32
    scf.if %2 {
      %cst = arith.constant 0.000000e+00 : f32
      %16 = vector.broadcast %cst : f32 to vector<8x128xf32>
      %c0_14 = arith.constant 0 : index
      %c0_15 = arith.constant 0 : index
      %17 = vector.load %arg5[%c0_14, %c0_15] : memref<8x128xf32, #tpu.memory_space<vmem>>, vector<8x128xf32>
      tpu.vector_store %arg5[%c0_14, %c0_15], %16 {strides = array<i32>} : memref<8x128xf32, #tpu.memory_space<vmem>>, vector<8x128xf32>,
      %cst_16 = arith.constant 0.000000e+00 : f32
      %18 = vector.broadcast %cst_16 : f32 to vector<8x128xf32>
      %c0_17 = arith.constant 0 : index
      %c0_18 = arith.constant 0 : index
      %19 = vector.load %arg6[%c0_17, %c0_18] : memref<8x128xf32, #tpu.memory_space<vmem>>, vector<8x128xf32>
      tpu.vector_store %arg6[%c0_17, %c0_18], %18 {strides = array<i32>} : memref<8x128xf32, #tpu.memory_space<vmem>>, vector<8x128xf32>,
    } else {
    }
    %c0 = arith.constant 0 : index
    %c0_1 = arith.constant 0 : index
    %3 = vector.load %arg2[%c0, %c0_1] : memref<8x128xf32, #tpu.memory_space<vmem>>, vector<8x128xf32>
    %c0_2 = arith.constant 0 : index
    %c0_3 = arith.constant 0 : index
    %4 = vector.load %arg3[%c0_2, %c0_3] : memref<8x128xf32, #tpu.memory_space<vmem>>, vector<8x128xf32>
    %5 = arith.mulf %3, %4 : vector<8x128xf32>
    %6 = arith.addf %3, %4 : vector<8x128xf32>
    %c0_4 = arith.constant 0 : index
    %c0_5 = arith.constant 0 : index
    %7 = vector.load %arg5[%c0_4, %c0_5] : memref<8x128xf32, #tpu.memory_space<vmem>>, vector<8x128xf32>
    %8 = arith.addf %7, %5 : vector<8x128xf32>
    %c0_6 = arith.constant 0 : index
    %c0_7 = arith.constant 0 : index
    %9 = vector.load %arg5[%c0_6, %c0_7] : memref<8x128xf32, #tpu.memory_space<vmem>>, vector<8x128xf32>
    tpu.vector_store %arg5[%c0_6, %c0_7], %8 {strides = array<i32>} : memref<8x128xf32, #tpu.memory_space<vmem>>, vector<8x128xf32>,
    %c0_8 = arith.constant 0 : index
    %c0_9 = arith.constant 0 : index
    %10 = vector.load %arg6[%c0_8, %c0_9] : memref<8x128xf32, #tpu.memory_space<vmem>>, vector<8x128xf32>
    %11 = arith.addf %10, %6 : vector<8x128xf32>
    %c0_10 = arith.constant 0 : index
    %c0_11 = arith.constant 0 : index
    %12 = vector.load %arg6[%c0_10, %c0_11] : memref<8x128xf32, #tpu.memory_space<vmem>>, vector<8x128xf32>
    tpu.vector_store %arg6[%c0_10, %c0_11], %11 {strides = array<i32>} : memref<8x128xf32, #tpu.memory_space<vmem>>, vector<8x128xf32>,
    %c0_i32_12 = arith.constant 0 : i32
    %13 = arith.cmpi eq, %arg1, %c0_i32_12 : i32
    %14 = arith.extui %13 : i1 to i32
    %c0_i32_13 = arith.constant 0 : i32
    %15 = arith.cmpi ne, %14, %c0_i32_13 : i32
    scf.if %15 {
      %c0_14 = arith.constant 0 : index
      %c0_15 = arith.constant 0 : index
      %16 = vector.load %arg5[%c0_14, %c0_15] : memref<8x128xf32, #tpu.memory_space<vmem>>, vector<8x128xf32>
      %cst = arith.constant dense<0.000000e+00> : vector<128xf32>
      %17 = vector.multi_reduction <add>, %16, %cst [0] : vector<8x128xf32> to vector<128xf32>
      %18 = vector.shape_cast %17 : vector<128xf32> to vector<1x128xf32>
      %c0_16 = arith.constant 0 : index
      %c0_17 = arith.constant 0 : index
      %19 = vector.load %arg6[%c0_16, %c0_17] : memref<8x128xf32, #tpu.memory_space<vmem>>, vector<8x128xf32>
      %cst_18 = arith.constant dense<0.000000e+00> : vector<128xf32>
      %20 = vector.multi_reduction <add>, %19, %cst_18 [0] : vector<8x128xf32> to vector<128xf32>
      %21 = vector.shape_cast %20 : vector<128xf32> to vector<1x128xf32>
      %cst_19 = arith.constant 2.000000e+00 : f32
      %22 = vector.broadcast %cst_19 : f32 to vector<1x128xf32>
      %23 = arith.mulf %22, %18 : vector<1x128xf32>
      %cst_20 = arith.constant 9.99999997E-7 : f32
      %24 = vector.broadcast %cst_20 : f32 to vector<1x128xf32>
      %25 = arith.addf %21, %24 : vector<1x128xf32>
      %26 = arith.divf %23, %25 : vector<1x128xf32>
      %cst_21 = arith.constant 1.000000e+00 : f32
      %27 = vector.broadcast %cst_21 : f32 to vector<1x128xf32>
      %28 = arith.subf %27, %26 : vector<1x128xf32>
      %cst_22 = arith.constant dense<0.000000e+00> : vector<1xf32>
      %29 = vector.multi_reduction <add>, %28, %cst_22 [1] : vector<1x128xf32> to vector<1xf32>
      %30 = vector.shape_cast %29 : vector<1xf32> to vector<1x1xf32>
      %31 = vector.shape_cast %30 : vector<1x1xf32> to vector<1x1xf32>
      %32 = vector.broadcast %31 : vector<1x1xf32> to vector<8x128xf32>
      %c0_23 = arith.constant 0 : index
      %c0_24 = arith.constant 0 : index
      %33 = vector.load %arg4[%c0_23, %c0_24] : memref<8x128xf32, #tpu.memory_space<vmem>>, vector<8x128xf32>
      tpu.vector_store %arg4[%c0_23, %c0_24], %32 {strides = array<i32>} : memref<8x128xf32, #tpu.memory_space<vmem>>, vector<8x128xf32>,
    } else {
    }
    return
  }
  func.func @transform_0(%arg0: i32, %arg1: i32) -> (i32, i32) {
    %c0_i32 = arith.constant 0 : i32
    return %arg1, %arg0 : i32, i32
  }
  func.func @transform_1(%arg0: i32, %arg1: i32) -> (i32, i32) {
    %c0_i32 = arith.constant 0 : i32
    return %arg1, %arg0 : i32, i32
  }
  func.func @transform_2(%arg0: i32, %arg1: i32) -> (i32, i32) {
    %c0_i32 = arith.constant 0 : i32
    %c0_i32_0 = arith.constant 0 : i32
    return %c0_i32, %arg0 : i32, i32
  }
}

</mosaic_0001>

<bundles_post_ra>
// kernel: tpu_custom_call.1
= control target key start
LH: loop header
LB: loop body
LE: loop exit
PB: predicated region body
PF: predicated region fallthrough
CT: control target
= control target key end

     0   :  { %7 = vsyncpa [#allocation5], 0  ;;  %s852_s0 = inlined_call_operand.hbm [shape: f32[8,256], index: 0, kind: input, shape index: {}]   ;;  %s853_s1 = inlined_call_operand.hbm [shape: f32[8,256], index: 1, kind: input, shape index: {}]   ;;  %s854_s2 = inlined_call_operand.hbm [shape: f32[8,256], index: 2, kind: output, shape index: {}]  }
   0x1   :  { %9 = vsyncpa [#allocation5 + $0x1], 0 }
   0x2   :  { %10 = vsyncpa [#allocation8], 0 }
   0x3   :  { %12 = vsyncpa [#allocation8 + $0x1], 0 }
   0x4   :  { %13 = vsyncpa [#allocation6], 0 }
   0x5   :  { %15 = vsyncpa [#allocation6 + $0x1], 0  ;;  %s627_s9 = smov 0   ;;  %s629_s10 = smov 0  }
   0x6   :  { %s631_s11 = smov 0   ;;  %s633_s12 = smov 0  }
   0x7   :  { %s635_s13 = smov 0   ;;  %s637_s14 = smov 0  }
   0x8 LB: > { %s376_s15 = sadd.s32 4294967295, %s607_s14   ;;  %s377_s16 = sadd.s32 4294967294, %s607_s14   ;;  %s607_s14 = sphi %s637_s14, %s21_s14   ;;  %s603_s13 = sphi %s635_s13, %s874_s13   ;;  %s599_s12 = sphi %s633_s12, %s873_s12   ;;  %s595_s11 = sphi %s631_s11, %s872_s11   ;;  %s591_s10 = sphi %s629_s10, %s871_s10   ;;  %s587_s9 = sphi %s627_s9, %s870_s9  }
   0x9   : > { %s33_s17 = sadd.s32 1, %s603_s13  ;;  %s42_s18 = sadd.s32 1, %s595_s11 }
   0xa   : > { %p35_p0 = scmp.ge.s32.totalorder %s33_s17, 2  ;;  %p49_p1 = scmp.ne.s32.totalorder %s595_s11, %s591_s10 }
   0xb   : > { %p50_p2 = scmp.eq.s32.totalorder %s607_s14, 0  ;;  %p55_p3 = scmp.ne.s32.totalorder %s591_s10, %s587_s9 }
   0xc   : > { %s876_s17 = smov (%p35_p0, %s33_s17), 0  ;;  %p56_p5 = scmp.eq.s32.totalorder %s376_s15, 0 }
   0xd   : > { %p668_p4 = por %p50_p2, %p49_p1  ;;  %s38_s20 = ssub.s32 %s603_s13, %s876_s17 }
   0xe   : > { %p107_p6 = scmp.eq.s32.totalorder %s376_s15, 1  ;;  %p40_p7 = scmp.eq.s32.totalorder %s38_s20, 0 }
   0xf   : > { %p674_p8 = por %p56_p5, %p55_p3  ;;  %p113_p10 = scmp.eq.s32.totalorder %s377_s16, 1 }
  0x10   : > { %p678_p9 = por %p107_p6, %p49_p1  ;;  %p409_p13 = scmp.lt.s32.totalorder %s607_s14, 2 }
  0x11   : > { %s858_s21 = scalar_select %p674_p8, 1, 0 }
  0x12   : > { %s859_s22 = scalar_select %p678_p9, 1, 0 }
  0x13   : > { %s683_s23 = scalar_select %p40_p7, %s595_s11, %s42_s18  }
  0x14   : > { %p685_p11 = por %p113_p10, %p55_p3  ;;  %s692_s25 = sand.u32 1, %s595_s11  }
  0x15   : > { %s380_s26 = sshll.u32 %s692_s25, 3  ;;  %s381_s27 = sshll.u32 %s603_s13, 7 }
  0x16   : > { %s860_s24 = scalar_select %p685_p11, 1, 0 }
  0x17   : > { %s701_s30 = scalar_lea.hbm %s852_s0, %s381_s27  ;;  %s137_s3 = scalar_lea.vmem [#allocation4], %s380_s26 }
  0x18   : > { %s146_s4 = sshll.u32 %s137_s3, 4  ;;  %p709_p0 = pnand %p409_p13, %p668_p4  ;;  %s705_s4 = int_to_ptr.vmem [resolvable:$true] %s146_s4 }
  0x19   : > { %s134_s6 = scalar_lea.sflag [#allocation5], %s692_s25  ;;  %s461_s7 = scalar_lea.hbm %s701_s30, 128 }
  0x1a   : > { %p462_p3 = scmp.ne.s32.totalorder %s701_s30, %s461_s7  ;;  %p463_p5 = pneg %p709_p0 }
  0x1b   : > { %s466_s16 = scalar_lea.hbm %s852_s0, 256  ;;  %p467_p4 = scmp.lt.u32.totalorder %s701_s30, %s852_s0 }
  0x1c   : > { %p464_p6 = pnand %p463_p5, %p462_p3  ;;  %p468_p10 = scmp.lt.u32.totalorder %s466_s16, %s461_s7 }
  0x1d   : > { %p470_p12 = scmp.lt.u32.totalorder %s461_s7, %s701_s30 }
  0x1e   : > { %p465_p7 = pneg %p464_p6  ;;  %p469_p13 = por %p468_p10, %p467_p4 }
  0x20   : > { %p471_p1 = por %p470_p12, %p469_p13 }
  0x22   : > { %p472_p2 = pnand %p471_p1, %p465_p7 }
  0x24   : > { %475 = shalt.err (!%p472_p2)
}
  0x25   : > { %s476_s20 = scalar_lea.vmem %s705_s4, 128  ;;  %s609_s28 = smov [#allocation4]  }
  0x26   : > { %p477_p3 = scmp.ne.s32.totalorder %s705_s4, %s476_s20  ;;  %s481_s29 = sshll.u32 %s609_s28, 4  ;;  %s482_s29 = int_to_ptr.vmem [resolvable:$false] %s481_s29 }
  0x27   : > { %s483_s3 = scalar_lea.vmem %s482_s29, 256  ;;  %p484_p9 = scmp.lt.s32.totalorder %s705_s4, %s482_s29 }
  0x28   : > { %p479_p6 = pnand %p477_p3, %p463_p5  ;;  %p485_p4 = scmp.lt.s32.totalorder %s483_s3, %s476_s20 }
  0x2a   : > { %p480_p11 = pneg %p479_p6  ;;  %p486_p10 = por %p485_p4, %p484_p9 }
  0x2c   : > { %p487_p12 = pnand %p486_p10, %p480_p11 }
  0x2e   : > { %490 = shalt.err (!%p487_p12)
}
  0x2f   : > { %401 = dma.hbm_to_vmem [thread:$0]  (!%p709_p0), %s701_s30, 128, %s705_s4, %s134_s6  }
  0x30   : > { %p862_p1 = scmp.lt.s32.totalorder %s607_s14, 3  ;;  %p863_p2 = scmp.ge.s32.totalorder %s607_s14, 1 }
  0x31   : > { %s754_s16 = scalar_lea.hbm %s853_s1, %s381_s27  ;;  %s157_s18 = scalar_lea.vmem [#allocation7], %s380_s26 }
  0x32   : > { %p745_p7 = pnand %p863_p2, %p862_p1  ;;  %s166_s19 = sshll.u32 %s157_s18, 4  ;;  %s167_s19 = int_to_ptr.vmem [resolvable:$true] %s166_s19 }
  0x33   : > { %s154_s30 = scalar_lea.sflag [#allocation8], %s692_s25  ;;  %s491_s4 = scalar_lea.hbm %s754_s16, 128 }
  0x34   : > { %s864_s7 = scalar_select %p745_p7, 1, 0 }
  0x35   : > { %p492_p9 = scmp.ne.s32.totalorder %s754_s16, %s491_s4  ;;  %s496_s27 = scalar_lea.hbm %s853_s1, 256 }
  0x36   : > { %p497_p3 = scmp.lt.u32.totalorder %s754_s16, %s853_s1  ;;  %p498_p6 = scmp.lt.u32.totalorder %s496_s27, %s491_s4 }
  0x37   : > { %p494_p11 = pnand %p492_p9, %p463_p5  ;;  %p500_p10 = scmp.lt.u32.totalorder %s491_s4, %s754_s16 }
  0x38   : > { %p499_p4 = por %p498_p6, %p497_p3 }
  0x39   : > { %p495_p13 = pneg %p494_p11 }
  0x3a   : > { %p501_p12 = por %p500_p10, %p499_p4 }
  0x3c   : > { %p502_p1 = pnand %p501_p12, %p495_p13 }
  0x3e   : > { %505 = shalt.err (!%p502_p1)
}
  0x3f   : > { %s506_s25 = scalar_lea.vmem %s167_s19, 128  ;;  %s610_s26 = smov [#allocation7]  }
  0x40   : > { %p507_p2 = scmp.ne.s32.totalorder %s167_s19, %s506_s25  ;;  %s511_s3 = sshll.u32 %s610_s26, 4  ;;  %s512_s3 = int_to_ptr.vmem [resolvable:$false] %s511_s3 }
  0x41   : > { %s513_s8 = scalar_lea.vmem %s512_s3, 256  ;;  %p514_p8 = scmp.lt.s32.totalorder %s167_s19, %s512_s3 }
  0x42   : > { %p509_p9 = pnand %p507_p2, %p463_p5  ;;  %p515_p7 = scmp.lt.s32.totalorder %s513_s8, %s506_s25 }
  0x44   : > { %p510_p11 = pneg %p509_p9  ;;  %p516_p3 = por %p515_p7, %p514_p8 }
  0x46   : > { %p517_p6 = pnand %p516_p3, %p510_p11 }
  0x48   : > { %520 = shalt.err (!%p517_p6)
}
  0x49   : > { %404 = dma.hbm_to_vmem [thread:$0]  (!%p709_p0), %s754_s16, 128, %s167_s19, %s154_s30  }
  0x4a   : > { %p865_p13 = scmp.ne.s32.totalorder %s864_s7, 0 }
  0x4b   : > { %s781_s15 = sand.u32 (!%p865_p13), 1, %s591_s10   ;;  %p866_p8 = scmp.ne.s32.totalorder (!%p865_p13), %s858_s21, 0 }
  0x4c   : > { %175 = sbr.rel (%p865_p13) target bundleno = 274 (0x112), region = 28  ;;  %s784_s18 = sshll.u32 (!%p865_p13), %s781_s15, 3 }
  0x4d   : > { %s178_s4 = scalar_lea.sflag (!%p865_p13), [#allocation5], %s781_s15  ;;  %s181_s6 = scalar_lea.vmem (!%p865_p13), [#allocation4], %s784_s18 }
  0x53   : > { %574 = dma.done.wait (%p866_p8), %s178_s4, 128  }
  0x54   : > { %576 = vsyncadd (%p866_p8), %s178_s4, 4294967168  ;;  %s187_s5 = scalar_lea.sflag [#allocation8], %s781_s15  ;;  %s190_s7 = scalar_lea.vmem [#allocation7], %s784_s18 }
  0x55   : > { %578 = dma.done.wait (%p866_p8), %s187_s5, 128  }
  0x56   : > { %580 = vsyncadd (%p866_p8), %s187_s5, 4294967168  ;;  %v222_v0 = vld [vmem:[%s181_s6] sm:$0xff]  ;;  %v223_v1 = vld [vmem:[%s190_s7] sm:$0xff]  ;;  %s215_s21 = scalar_lea.vmem [#allocation9], %s784_s18  ;;  %s389_s19 = sshll.u32 %s599_s12, 7 }
  0x57   : > { %v224_v2 = vmul.f32 %v223_v1, %v222_v0  ;;  %v225_v3 = vadd.f32 %v223_v1, %v222_v0  ;;  %s271_s16 = sshll.u32 %s215_s21, 4  ;;  %s805_s27 = scalar_lea.hbm %s854_s2, %s389_s19  ;;  %s800_s16 = int_to_ptr.vmem [resolvable:$true] %s271_s16 }
  0x58   : > { %s258_s28 = scalar_lea.sflag [#allocation6], %s781_s15  ;;  %s521_s29 = scalar_lea.vmem %s800_s16, 128 }
  0x59   : > { %v236_v4 = vrot.slane %v224_v2, 4  ;;  %v243_v5 = vrot.slane %v225_v3, 4  ;;  %p522_p0 = scmp.ne.s32.totalorder %s800_s16, %s521_s29  ;;  %p867_p5 = scmp.ne.s32.totalorder %s859_s22, 0 }
  0x5a   : > { %s611_s25 = smov [#allocation9]  }
  0x5b   : > { %v237_v6 = vadd.f32 %v236_v4, %v224_v2  ;;  %v244_v7 = vadd.f32 %v243_v5, %v225_v3  ;;  %p523_p7 = pnand %p522_p0, %p867_p5  ;;  %s525_s12 = sshll.u32 %s611_s25, 4  ;;  %s526_s12 = int_to_ptr.vmem [resolvable:$false] %s525_s12 }
  0x5c   : > { %s527_s26 = scalar_lea.vmem %s526_s12, 256  ;;  %p528_p10 = scmp.lt.s32.totalorder %s800_s16, %s526_s12 }
  0x5d   : > { %v245_v8 = vrot.slane %v244_v7, 2  ;;  %v238_v9 = vrot.slane %v237_v6, 2  ;;  %p524_p4 = pneg %p523_p7  ;;  %p529_p12 = scmp.lt.s32.totalorder %s527_s26, %s521_s29 }
  0x5f   : > { %v246_v10 = vadd.f32 %v245_v8, %v244_v7  ;;  %v239_v12 = vadd.f32 %v238_v9, %v237_v6  ;;  %p530_p1 = por %p529_p12, %p528_p10 }
  0x61   : > { %v247_v11 = vrot.slane %v246_v10, 1  ;;  %v240_v15 = vrot.slane %v239_v12, 1  ;;  %p531_p2 = pnand %p530_p1, %p524_p4 }
  0x63   : > { %v248_v13 = vadd.f32 %v247_v11, %v246_v10  ;;  %v241_v16 = vadd.f32 %v240_v15, %v239_v12 }
  0x65   : > { %v250_v14 = vadd.f32 1e-06, %v248_v13  ;;  %v249_v17 = vmul.f32 2.0, %v241_v16 }
  0x67   : > { %459 = vrcp.f32 %v250_v14 }
  0x71   : > { %v460_v18 = vpop.eup %459 }
  0x72   : > { %v252_v19 = vmul.f32 %v460_v18, %v249_v17 }
  0x74   : > { %v253_v20 = vsub.f32 1.0, %v252_v19 }
  0x76   : > { %254 = vadd.xlane.f32.xlu0 %v253_v20 }
 0x103   : > { %v255_v21 = vpop.xlane.xlu0 %254 }
 0x104   : > { %256 = vst [vmem:[%s215_s21] sm:$0xff] %v255_v21 }
 0x105   : > { %534 = shalt.err (!%p531_p2)
}
 0x106   : > { %s535_s3 = scalar_lea.hbm %s805_s27, 128  ;;  %s539_s18 = scalar_lea.hbm %s854_s2, 256 }
 0x107   : > { %p536_p9 = scmp.ne.s32.totalorder %s805_s27, %s535_s3  ;;  %p540_p6 = scmp.lt.u32.totalorder %s805_s27, %s854_s2 }
 0x108   : > { %p541_p13 = scmp.lt.u32.totalorder %s539_s18, %s535_s3  ;;  %p543_p0 = scmp.lt.u32.totalorder %s535_s3, %s805_s27 }
 0x109   : > { %p537_p11 = pnand %p536_p9, %p867_p5 }
 0x10a   : > { %p542_p8 = por %p541_p13, %p540_p6 }
 0x10b   : > { %p538_p3 = pneg %p537_p11 }
 0x10c   : > { %p544_p7 = por %p543_p0, %p542_p8 }
 0x10e   : > { %p545_p4 = pnand %p544_p7, %p538_p3 }
 0x110   : > { %548 = shalt.err (!%p545_p4)
}
 0x111   : > { %396 = dma.vmem_to_hbm [thread:$0]  (%p867_p5), %s800_s16, 128, %s805_s27, %s258_s28  }
 0x112 PF: > { %s283_s5 = sand.u32 1, %s587_s9   ;;  %p868_p10 = scmp.ne.s32.totalorder %s860_s24, 0 }
 0x113   : > { %p869_p12 = scmp.ge.s32.totalorder %s607_s14, 2  ;;  %s284_s7 = scalar_lea.sflag [#allocation6], %s283_s5 }
 0x115   : > { %p406_p1 = pnand %p869_p12, %p868_p10 }
 0x117   : > { %582 = dma.done.wait (!%p406_p1), %s284_s7, 128  }
 0x118   : > { %584 = vsyncadd (!%p406_p1), %s284_s7, 4294967168  ;;  %s21_s14 = sadd.s32 1, %s607_s14   ;;  %s870_s9 = smov %s591_s10 }
 0x119   : > { %p18_p2 = scmp.ge.s32.totalorder %s21_s14, 4   ;;  %s871_s10 = smov %s595_s11 }
 0x11a   : > { %s872_s11 = smov %s683_s23  ;;  %s873_s12 = smov %s603_s13 }
 0x11b   : > { %s874_s13 = smov %s876_s17  ;;  %20 = sbr.rel (!%p18_p2) target bundleno = 8 (0x8), region = 94 }
 0x122   :  { %289 = vsyncpa [#allocation5], 1 }
 0x123   :  { %291 = vsyncpa [#allocation5 + $0x1], 1 }
 0x124   :  { %292 = vsyncpa [#allocation8], 1 }
 0x125   :  { %294 = vsyncpa [#allocation8 + $0x1], 1 }
 0x126   :  { %295 = vsyncpa [#allocation6], 1 }
 0x127   :  { %297 = vsyncpa [#allocation6 + $0x1], 1 }

</bundles_post_ra>
